<compile_context>
chip_gen: v7x
topology: tpu7x:2x2x1
jax: 0.10.0
libtpu: 0.0.40
codegen_flags: <defaults>
</compile_context>

<pallas_src>
import functools

import jax
import jax.numpy as jnp
from jax.experimental import pallas as pl
from jax.experimental.pallas import tpu as pltpu

# ----- hyperparameters (small, synthetic) -----
IN_CHANNELS = 32      # in_channels
FILTER_CHANNELS = 32  # filter_channels
FILTER_SIZE = 3       # filter_size (odd -> PyTorch padding=K//2 keeps length)
P_DROPOUT = 0.1       # NOTE: dropout is identity at inference; not applied here
LN_EPS = 1e-4         # GlowTTS channel-wise LayerNorm epsilon


def duration_predictor_kernel(x_ref, m_ref, w1_ref, w2_ref, pp_ref, wp_ref,
                              o_ref, *, seq_len, batch):
    """Single grid step; batch folded onto the lane (time) axis.

    x_ref:  [Cin, L]   L = round_up(B*T, 128); columns [b*T + t] hold x[b,:,t]
    m_ref:  [1,   L]   folded sequence mask (zero in the lane-padding region)
    w1_ref: [Cf, K*Cin]  packed conv weights: w1[o, k*Cin+c] = W_torch[o, c, k]
    w2_ref: [Cf, K*Cf]
    pp_ref: [Cf, 7]    cols: b1, g1, be1, b2, g2, be2, bp(bcast)
    wp_ref: [1,  Cf]   1x1 projection weight as a lane row (MXU-friendly)
    o_ref:  [1,  L]    lane-dense output slab (wrapper slices/reshapes to [B,1,T])
    """
    f32 = jnp.float32
    cin, lanes = x_ref.shape
    cf = w1_ref.shape[0]
    pad = FILTER_SIZE // 2

    x = x_ref[...].astype(f32)
    m = m_ref[...].astype(f32)
    w1 = w1_ref[...]
    w2 = w2_ref[...]
    pp = pp_ref[...]                     # load once, slice in-register
    wp = wp_ref[...]                     # [1, Cf]

    b1, g1, be1 = pp[:, 0:1], pp[:, 1:2], pp[:, 2:3]
    b2, g2, be2 = pp[:, 3:4], pp[:, 4:5], pp[:, 5:6]
    bp = pp[0:1, 6:7]                    # [1, 1]

    # Hoisted mask broadcasts (JAX does not CSE broadcast_in_dim).
    m_cin = jnp.broadcast_to(m, (cin, lanes))
    m_cf = jnp.broadcast_to(m, (cf, lanes))

    # Per-lane position within its length-T slice (batch folded on lanes).
    lane = jax.lax.broadcasted_iota(jnp.int32, (1, lanes), 1)
    pos = lane
    for b in range(1, batch):
        pos = jnp.where(lane >= b * seq_len, lane - b * seq_len, pos)

    # Per conv tap d in [-pad, pad]: (positive roll shift, keep-mask).
    # roll(h, s)[t] == h[t - s]; edge/keep masks implement the "same" zero
    # padding at each batch slice's physical edges (and kill cross-slice wrap).
    taps = []
    for d in range(-pad, pad + 1):
        if d == 0:
            taps.append((0, None))
        elif d < 0:
            taps.append((-d, pos >= -d))
        else:
            taps.append((lanes - d, pos <= seq_len - 1 - d))

    def conv_block(h, w, bias, gamma, beta):
        # K shifted copies via XLU lane rolls -> one fused im2col MXU matmul.
        parts = []
        for shift, keep in taps:
            if keep is None:
                parts.append(h)
            else:
                parts.append(jnp.where(keep, pltpu.roll(h, shift, axis=1), 0.0))
        him = jnp.concatenate(parts, axis=0)               # [K*C, L]
        hc = jnp.dot(w, him, preferred_element_type=f32) + bias
        hr = jnp.maximum(hc, 0.0)
        # Fused channel LayerNorm moments: var = E[x^2] - mean^2.
        mean = jnp.mean(hr, axis=0, keepdims=True)
        var = jnp.mean(hr * hr, axis=0, keepdims=True) - mean * mean
        return gamma * (hr - mean) * jax.lax.rsqrt(var + LN_EPS) + beta
        # (dropout omitted: identity in eval mode)

    h = conv_block(x * m_cin, w1, b1, g1, be1)
    h = conv_block(h * m_cf, w2, b2, g2, be2)
    # 1x1 projection on the MXU -> lane-dense [1, L] row.
    y = jnp.dot(wp, h * m_cf, preferred_element_type=f32) + bp
    o_ref[...] = y.astype(o_ref.dtype)


def duration_predictor(x_nct, mask_n1t, params):
    """x_nct: [B, Cin, T] (PyTorch NCT), mask_n1t: [B, 1, T] -> [B, 1, T]."""
    B, Cin, T = x_nct.shape
    BT = B * T
    lanes = ((BT + 127) // 128) * 128

    # Layout plumbing only (no compute hoisted): fold batch onto the lane axis
    # and zero-pad to a multiple of 128 lanes so every in-kernel op runs on
    # full vregs and the output store is lane-dense.
    x_f = jnp.transpose(x_nct, (1, 0, 2)).reshape(Cin, BT)
    m_f = jnp.transpose(mask_n1t, (1, 0, 2)).reshape(1, BT)
    x_f = jnp.pad(x_f, ((0, 0), (0, lanes - BT)))
    m_f = jnp.pad(m_f, ((0, 0), (0, lanes - BT)))

    vmem = pl.BlockSpec(memory_space=pltpu.MemorySpace.VMEM)
    kernel = functools.partial(duration_predictor_kernel, seq_len=T, batch=B)
    y_flat = pl.pallas_call(
        kernel,
        out_shape=jax.ShapeDtypeStruct((1, lanes), x_nct.dtype),
        in_specs=[vmem] * 6,
        out_specs=vmem,
    )(x_f, m_f, params["w1"], params["w2"], params["pp"], params["wp"])
    # TODO(synk): at realistic T, tile T with a BlockSpec on a "parallel" grid
    # axis (halo = K//2) sized against the per-generation scoped-VMEM budget.
    return y_flat[:, :BT].reshape(B, T)[:, None, :]


def ref_duration_predictor(x_nct, mask_n1t, params):
    """Pure-JAX reference mirroring the PyTorch forward (eval mode), NCT layout."""
    pp = params["pp"]
    b1, g1, be1 = pp[:, 0], pp[:, 1], pp[:, 2]
    b2, g2, be2 = pp[:, 3], pp[:, 4], pp[:, 5]
    bp = pp[0, 6]
    wp = params["wp"][0]
    K = FILTER_SIZE
    pad = K // 2

    def conv_block(h, m, w_packed, bias, gamma, beta):
        Bb, C, T = h.shape
        Cf = w_packed.shape[0]
        w = w_packed.reshape(Cf, K, C)          # w[o, k, c] = W_torch[o, c, k]
        hm = h * m
        hp = jnp.pad(hm, ((0, 0), (0, 0), (pad, pad)))
        acc = jnp.zeros((Bb, Cf, T), jnp.float32)
        for k in range(K):
            acc = acc + jnp.einsum("oc,bct->bot", w[:, k, :], hp[:, :, k:k + T])
        acc = acc + bias[None, :, None]
        acc = jnp.maximum(acc, 0.0)
        mean = jnp.mean(acc, axis=1, keepdims=True)
        var = jnp.mean(jnp.square(acc - mean), axis=1, keepdims=True)
        return (gamma[None, :, None] * (acc - mean) * jax.lax.rsqrt(var + LN_EPS)
                + beta[None, :, None])

    h = conv_block(x_nct, mask_n1t, params["w1"], b1, g1, be1)
    h = conv_block(h, mask_n1t, params["w2"], b2, g2, be2)
    y = jnp.einsum("c,bct->bt", wp, h * mask_n1t)[:, None, :] + bp
    return y


def init_params(key, cin, cf, k):
    ks = jax.random.split(key, 6)
    s1 = 1.0 / jnp.sqrt(cin * k)
    s2 = 1.0 / jnp.sqrt(cf * k)
    # Conv weights packed as [Cout, K*Cin]; from PyTorch [Cout, Cin, K] use
    #   w_packed = W_torch.transpose(0, 2, 1).reshape(Cout, K*Cin).
    w1 = jax.random.normal(ks[0], (cf, k * cin), jnp.float32) * s1
    w2 = jax.random.normal(ks[1], (cf, k * cf), jnp.float32) * s2
    b1 = jax.random.normal(ks[2], (cf,), jnp.float32) * 0.01
    b2 = jax.random.normal(ks[3], (cf,), jnp.float32) * 0.01
    wp = jax.random.normal(ks[4], (cf,), jnp.float32) / jnp.sqrt(cf)
    bp = jax.random.normal(ks[5], (), jnp.float32) * 0.01
    g1 = jnp.ones((cf,), jnp.float32)
    be1 = jnp.zeros((cf,), jnp.float32)
    g2 = jnp.ones((cf,), jnp.float32)
    be2 = jnp.zeros((cf,), jnp.float32)
    # Per-channel params packed into one [Cf, 7] tensor: b1,g1,be1,b2,g2,be2,bp.
    pp = jnp.stack(
        [b1, g1, be1, b2, g2, be2, jnp.full((cf,), bp, jnp.float32)], axis=1)
    # 1x1 projection weight as a lane row [1, Cf] (MXU-friendly orientation).
    return {"w1": w1, "w2": w2, "pp": pp, "wp": wp[None, :]}


if __name__ == "__main__":
    B, T = 2, 16
    key = jax.random.PRNGKey(0)
    k_x, k_p = jax.random.split(key)

    params = init_params(k_p, IN_CHANNELS, FILTER_CHANNELS, FILTER_SIZE)

    # x in PyTorch NCT layout [B, Cin, T]; mask [B, 1, T] (sequence lengths 16, 11)
    x = jax.random.normal(k_x, (B, IN_CHANNELS, T), jnp.float32)
    lengths = jnp.array([16, 11], jnp.int32)
    mask = (jnp.arange(T)[None, None, :] < lengths[:, None, None]).astype(jnp.float32)

    out = jax.block_until_ready(duration_predictor(x, mask, params))
    ref = jax.block_until_ready(ref_duration_predictor(x, mask, params))

    assert out.shape == (B, 1, T), out.shape
    assert jnp.allclose(out, ref, rtol=1e-4, atol=1e-4), float(jnp.max(jnp.abs(out - ref)))
    print("KERNEL_OK")
</pallas_src>

<mosaic_0001>
module attributes {stable_mosaic.version = 11 : i64} {
  func.func @duration_predictor_kernel(%arg0: memref<32x128xf32, #tpu.memory_space<vmem>>, %arg1: memref<1x128xf32, #tpu.memory_space<vmem>>, %arg2: memref<32x96xf32, #tpu.memory_space<vmem>>, %arg3: memref<32x96xf32, #tpu.memory_space<vmem>>, %arg4: memref<32x7xf32, #tpu.memory_space<vmem>>, %arg5: memref<1x32xf32, #tpu.memory_space<vmem>>, %arg6: memref<1x128xf32, #tpu.memory_space<vmem>>) attributes {dimension_semantics = [], scalar_prefetch = 0 : i64, scratch_operands = 0 : i64, tpu.core_type = #tpu.core_type<tc>} {
    %c0 = arith.constant 0 : index
    %c0_0 = arith.constant 0 : index
    %0 = vector.load %arg0[%c0, %c0_0] : memref<32x128xf32, #tpu.memory_space<vmem>>, vector<32x128xf32>
    %c0_1 = arith.constant 0 : index
    %c0_2 = arith.constant 0 : index
    %1 = vector.load %arg1[%c0_1, %c0_2] : memref<1x128xf32, #tpu.memory_space<vmem>>, vector<1x128xf32>
    %c0_3 = arith.constant 0 : index
    %c0_4 = arith.constant 0 : index
    %2 = vector.load %arg2[%c0_3, %c0_4] : memref<32x96xf32, #tpu.memory_space<vmem>>, vector<32x96xf32>
    %c0_5 = arith.constant 0 : index
    %c0_6 = arith.constant 0 : index
    %3 = vector.load %arg3[%c0_5, %c0_6] : memref<32x96xf32, #tpu.memory_space<vmem>>, vector<32x96xf32>
    %c0_7 = arith.constant 0 : index
    %c0_8 = arith.constant 0 : index
    %4 = vector.load %arg4[%c0_7, %c0_8] : memref<32x7xf32, #tpu.memory_space<vmem>>, vector<32x7xf32>
    %c0_9 = arith.constant 0 : index
    %c0_10 = arith.constant 0 : index
    %5 = vector.load %arg5[%c0_9, %c0_10] : memref<1x32xf32, #tpu.memory_space<vmem>>, vector<1x32xf32>
    %6 = vector.extract_strided_slice %4 {offsets = [0, 0], sizes = [32, 1], strides = [1, 1]} : vector<32x7xf32> to vector<32x1xf32>
    %7 = vector.extract_strided_slice %4 {offsets = [0, 1], sizes = [32, 1], strides = [1, 1]} : vector<32x7xf32> to vector<32x1xf32>
    %8 = vector.extract_strided_slice %4 {offsets = [0, 2], sizes = [32, 1], strides = [1, 1]} : vector<32x7xf32> to vector<32x1xf32>
    %9 = vector.extract_strided_slice %4 {offsets = [0, 3], sizes = [32, 1], strides = [1, 1]} : vector<32x7xf32> to vector<32x1xf32>
    %10 = vector.extract_strided_slice %4 {offsets = [0, 4], sizes = [32, 1], strides = [1, 1]} : vector<32x7xf32> to vector<32x1xf32>
    %11 = vector.extract_strided_slice %4 {offsets = [0, 5], sizes = [32, 1], strides = [1, 1]} : vector<32x7xf32> to vector<32x1xf32>
    %12 = vector.extract_strided_slice %4 {offsets = [0, 6], sizes = [1, 1], strides = [1, 1]} : vector<32x7xf32> to vector<1x1xf32>
    %13 = vector.shape_cast %1 : vector<1x128xf32> to vector<1x128xf32>
    %14 = vector.broadcast %13 : vector<1x128xf32> to vector<32x128xf32>
    %15 = vector.shape_cast %1 : vector<1x128xf32> to vector<1x128xf32>
    %16 = vector.broadcast %15 : vector<1x128xf32> to vector<32x128xf32>
    %17 = tpu.iota {dimensions = array<i32: 1>} : vector<1x128xi32>
    %c16_i32 = arith.constant 16 : i32
    %18 = vector.broadcast %c16_i32 : i32 to vector<1x128xi32>
    %19 = arith.cmpi sge, %17, %18 : vector<1x128xi32>
    %c16_i32_11 = arith.constant 16 : i32
    %20 = vector.broadcast %c16_i32_11 : i32 to vector<1x128xi32>
    %21 = arith.subi %17, %20 : vector<1x128xi32>
    %22 = arith.select %19, %21, %17 : vector<1x128xi1>, vector<1x128xi32>
    %c1_i32 = arith.constant 1 : i32
    %23 = vector.broadcast %c1_i32 : i32 to vector<1x128xi32>
    %24 = arith.cmpi sge, %22, %23 : vector<1x128xi32>
    %c14_i32 = arith.constant 14 : i32
    %25 = vector.broadcast %c14_i32 : i32 to vector<1x128xi32>
    %26 = arith.cmpi sle, %22, %25 : vector<1x128xi32>
    %27 = arith.mulf %0, %14 : vector<32x128xf32>
    %c1_i32_12 = arith.constant 1 : i32
    %28 = tpu.dynamic_rotate %27 by %c1_i32_12 dim 1 : vector<32x128xf32>, i32 -> vector<32x128xf32>
    %cst = arith.constant 0.000000e+00 : f32
    %29 = vector.shape_cast %24 : vector<1x128xi1> to vector<1x128xi1>
    %30 = vector.broadcast %29 : vector<1x128xi1> to vector<32x128xi1>
    %31 = vector.broadcast %cst : f32 to vector<32x128xf32>
    %32 = arith.select %30, %28, %31 : vector<32x128xi1>, vector<32x128xf32>
    %c127_i32 = arith.constant 127 : i32
    %33 = tpu.dynamic_rotate %27 by %c127_i32 dim 1 : vector<32x128xf32>, i32 -> vector<32x128xf32>
    %cst_13 = arith.constant 0.000000e+00 : f32
    %34 = vector.shape_cast %26 : vector<1x128xi1> to vector<1x128xi1>
    %35 = vector.broadcast %34 : vector<1x128xi1> to vector<32x128xi1>
    %36 = vector.broadcast %cst_13 : f32 to vector<32x128xf32>
    %37 = arith.select %35, %33, %36 : vector<32x128xi1>, vector<32x128xf32>
    %38 = tpu.concatenate %32, %27, %37 in 0 : vector<32x128xf32>, vector<32x128xf32>, vector<32x128xf32> -> vector<96x128xf32>
    %cst_14 = arith.constant dense<0.000000e+00> : vector<32x128xf32>
    %39 = tpu.matmul %2, %38, %cst_14 {dimension_numbers = #tpu.dot_dimension_numbers<[1], [0], [0], [1], [0, 0, 1, 1], [], []>} : vector<32x96xf32>, vector<96x128xf32>, vector<32x128xf32> -> vector<32x128xf32>
    %40 = vector.broadcast %6 : vector<32x1xf32> to vector<32x128xf32>
    %41 = arith.addf %39, %40 : vector<32x128xf32>
    %cst_15 = arith.constant 0.000000e+00 : f32
    %42 = vector.broadcast %cst_15 : f32 to vector<32x128xf32>
    %43 = arith.maximumf %41, %42 : vector<32x128xf32>
    %cst_16 = arith.constant dense<0.000000e+00> : vector<128xf32>
    %44 = vector.multi_reduction <add>, %43, %cst_16 [0] : vector<32x128xf32> to vector<128xf32>
    %45 = vector.shape_cast %44 : vector<128xf32> to vector<1x128xf32>
    %cst_17 = arith.constant 3.200000e+01 : f32
    %46 = vector.broadcast %cst_17 : f32 to vector<1x128xf32>
    %47 = arith.divf %45, %46 : vector<1x128xf32>
    %48 = arith.mulf %43, %43 : vector<32x128xf32>
    %cst_18 = arith.constant dense<0.000000e+00> : vector<128xf32>
    %49 = vector.multi_reduction <add>, %48, %cst_18 [0] : vector<32x128xf32> to vector<128xf32>
    %50 = vector.shape_cast %49 : vector<128xf32> to vector<1x128xf32>
    %cst_19 = arith.constant 3.200000e+01 : f32
    %51 = vector.broadcast %cst_19 : f32 to vector<1x128xf32>
    %52 = arith.divf %50, %51 : vector<1x128xf32>
    %53 = arith.mulf %47, %47 : vector<1x128xf32>
    %54 = arith.subf %52, %53 : vector<1x128xf32>
    %55 = vector.broadcast %47 : vector<1x128xf32> to vector<32x128xf32>
    %56 = arith.subf %43, %55 : vector<32x128xf32>
    %57 = vector.broadcast %7 : vector<32x1xf32> to vector<32x128xf32>
    %58 = arith.mulf %57, %56 : vector<32x128xf32>
    %cst_20 = arith.constant 9.99999974E-5 : f32
    %59 = vector.broadcast %cst_20 : f32 to vector<1x128xf32>
    %60 = arith.addf %54, %59 : vector<1x128xf32>
    %61 = math.rsqrt %60 : vector<1x128xf32>
    %62 = vector.broadcast %61 : vector<1x128xf32> to vector<32x128xf32>
    %63 = arith.mulf %58, %62 : vector<32x128xf32>
    %64 = vector.broadcast %8 : vector<32x1xf32> to vector<32x128xf32>
    %65 = arith.addf %63, %64 : vector<32x128xf32>
    %66 = arith.mulf %65, %16 : vector<32x128xf32>
    %c1_i32_21 = arith.constant 1 : i32
    %67 = tpu.dynamic_rotate %66 by %c1_i32_21 dim 1 : vector<32x128xf32>, i32 -> vector<32x128xf32>
    %cst_22 = arith.constant 0.000000e+00 : f32
    %68 = vector.shape_cast %24 : vector<1x128xi1> to vector<1x128xi1>
    %69 = vector.broadcast %68 : vector<1x128xi1> to vector<32x128xi1>
    %70 = vector.broadcast %cst_22 : f32 to vector<32x128xf32>
    %71 = arith.select %69, %67, %70 : vector<32x128xi1>, vector<32x128xf32>
    %c127_i32_23 = arith.constant 127 : i32
    %72 = tpu.dynamic_rotate %66 by %c127_i32_23 dim 1 : vector<32x128xf32>, i32 -> vector<32x128xf32>
    %cst_24 = arith.constant 0.000000e+00 : f32
    %73 = vector.shape_cast %26 : vector<1x128xi1> to vector<1x128xi1>
    %74 = vector.broadcast %73 : vector<1x128xi1> to vector<32x128xi1>
    %75 = vector.broadcast %cst_24 : f32 to vector<32x128xf32>
    %76 = arith.select %74, %72, %75 : vector<32x128xi1>, vector<32x128xf32>
    %77 = tpu.concatenate %71, %66, %76 in 0 : vector<32x128xf32>, vector<32x128xf32>, vector<32x128xf32> -> vector<96x128xf32>
    %cst_25 = arith.constant dense<0.000000e+00> : vector<32x128xf32>
    %78 = tpu.matmul %3, %77, %cst_25 {dimension_numbers = #tpu.dot_dimension_numbers<[1], [0], [0], [1], [0, 0, 1, 1], [], []>} : vector<32x96xf32>, vector<96x128xf32>, vector<32x128xf32> -> vector<32x128xf32>
    %79 = vector.broadcast %9 : vector<32x1xf32> to vector<32x128xf32>
    %80 = arith.addf %78, %79 : vector<32x128xf32>
    %cst_26 = arith.constant 0.000000e+00 : f32
    %81 = vector.broadcast %cst_26 : f32 to vector<32x128xf32>
    %82 = arith.maximumf %80, %81 : vector<32x128xf32>
    %cst_27 = arith.constant dense<0.000000e+00> : vector<128xf32>
    %83 = vector.multi_reduction <add>, %82, %cst_27 [0] : vector<32x128xf32> to vector<128xf32>
    %84 = vector.shape_cast %83 : vector<128xf32> to vector<1x128xf32>
    %cst_28 = arith.constant 3.200000e+01 : f32
    %85 = vector.broadcast %cst_28 : f32 to vector<1x128xf32>
    %86 = arith.divf %84, %85 : vector<1x128xf32>
    %87 = arith.mulf %82, %82 : vector<32x128xf32>
    %cst_29 = arith.constant dense<0.000000e+00> : vector<128xf32>
    %88 = vector.multi_reduction <add>, %87, %cst_29 [0] : vector<32x128xf32> to vector<128xf32>
    %89 = vector.shape_cast %88 : vector<128xf32> to vector<1x128xf32>
    %cst_30 = arith.constant 3.200000e+01 : f32
    %90 = vector.broadcast %cst_30 : f32 to vector<1x128xf32>
    %91 = arith.divf %89, %90 : vector<1x128xf32>
    %92 = arith.mulf %86, %86 : vector<1x128xf32>
    %93 = arith.subf %91, %92 : vector<1x128xf32>
    %94 = vector.broadcast %86 : vector<1x128xf32> to vector<32x128xf32>
    %95 = arith.subf %82, %94 : vector<32x128xf32>
    %96 = vector.broadcast %10 : vector<32x1xf32> to vector<32x128xf32>
    %97 = arith.mulf %96, %95 : vector<32x128xf32>
    %cst_31 = arith.constant 9.99999974E-5 : f32
    %98 = vector.broadcast %cst_31 : f32 to vector<1x128xf32>
    %99 = arith.addf %93, %98 : vector<1x128xf32>
    %100 = math.rsqrt %99 : vector<1x128xf32>
    %101 = vector.broadcast %100 : vector<1x128xf32> to vector<32x128xf32>
    %102 = arith.mulf %97, %101 : vector<32x128xf32>
    %103 = vector.broadcast %11 : vector<32x1xf32> to vector<32x128xf32>
    %104 = arith.addf %102, %103 : vector<32x128xf32>
    %105 = arith.mulf %104, %16 : vector<32x128xf32>
    %cst_32 = arith.constant dense<0.000000e+00> : vector<1x128xf32>
    %106 = tpu.matmul %5, %105, %cst_32 {dimension_numbers = #tpu.dot_dimension_numbers<[1], [0], [0], [1], [0, 0, 1, 1], [], []>} : vector<1x32xf32>, vector<32x128xf32>, vector<1x128xf32> -> vector<1x128xf32>
    %107 = vector.broadcast %12 : vector<1x1xf32> to vector<1x128xf32>
    %108 = arith.addf %106, %107 : vector<1x128xf32>
    %c0_33 = arith.constant 0 : index
    %c0_34 = arith.constant 0 : index
    %109 = vector.load %arg6[%c0_33, %c0_34] : memref<1x128xf32, #tpu.memory_space<vmem>>, vector<1x128xf32>
    tpu.vector_store %arg6[%c0_33, %c0_34], %108 {strides = array<i32>} : memref<1x128xf32, #tpu.memory_space<vmem>>, vector<1x128xf32>,
    return
  }
}

</mosaic_0001>

<bundles_post_ra>
// kernel: tpu_custom_call.1
= control target key start
LH: loop header
LB: loop body
LE: loop exit
PB: predicated region body
PF: predicated region fallthrough
CT: control target
= control target key end

     0   :  { %11 = vsyncpa [#allocation3], 0  ;;  %s1208_s0 = inlined_call_operand.vmem [shape: f32[32,128], index: 0, kind: input, shape index: {}]   ;;  %s1209_s1 = inlined_call_operand.vmem [shape: f32[1,128], index: 1, kind: input, shape index: {}]   ;;  %s1210_s2 = inlined_call_operand.hbm [shape: f32[32,96], index: 2, kind: input, shape index: {}]   ;;  %s1211_s3 = inlined_call_operand.hbm [shape: f32[32,96], index: 3, kind: input, shape index: {}]   ;;  %s1212_s4 = inlined_call_operand.vmem [shape: f32[32,7], index: 4, kind: input, shape index: {}]   ;;  %s1213_s5 = inlined_call_operand.vmem [shape: f32[1,32], index: 5, kind: input, shape index: {}]   ;;  %s1214_s6 = inlined_call_operand.hbm [shape: f32[1,128], index: 6, kind: output, shape index: {}]  }
   0x1   :  { %12 = vsyncpa [#allocation6], 0 }
   0x2   :  { %13 = vsyncpa [#allocation4], 0  ;;  %s985_s21 = smov [#allocation2]   ;;  %s913_s25 = scalar_lea.hbm %s1210_s2, 512 }
   0x3   :  { %s23_s22 = sshll.u32 %s985_s21, 4  ;;  %p914_p0 = scmp.ne.s32.totalorder %s1210_s2, %s913_s25  ;;  %s24_s22 = int_to_ptr.vmem [resolvable:$true] %s23_s22 }
   0x4   :  { %p917_p1 = scmp.lt.u32.totalorder %s913_s25, %s1210_s2 }
   0x6   :  { %p919_p2 = pnand %p917_p1, %p914_p0 }
   0x8   :  { %922 = shalt.err (!%p919_p2)
}
   0x9   :  { %s923_s30 = scalar_lea.vmem %s24_s22, 512  ;;  %p928_p4 = scmp.lt.s32.totalorder %s24_s22, %s24_s22 }
   0xa   :  { %p924_p3 = scmp.ne.s32.totalorder %s24_s22, %s923_s30  ;;  %p929_p5 = scmp.lt.s32.totalorder %s923_s30, %s923_s30 }
   0xc   :  { %p930_p6 = por %p929_p5, %p928_p4 }
   0xe   :  { %p931_p7 = pnand %p930_p6, %p924_p3 }
  0x10   :  { %934 = shalt.err (!%p931_p7)
}
  0x11   :  { %s986_s7 = smov 128   ;;  %s987_s8 = smov 8  }
  0x12   :  { %29 = dma.hbm_to_vmem [thread:$0]  %s1210_s2, 512, %s24_s22, [#allocation3], %s986_s7, %s986_s7, %s987_s8  }
  0x13   :  { %s988_s11 = smov [#allocation5]   ;;  %s935_s15 = scalar_lea.hbm %s1211_s3, 512 }
  0x14   :  { %s35_s12 = sshll.u32 %s988_s11, 4  ;;  %p936_p8 = scmp.ne.s32.totalorder %s1211_s3, %s935_s15  ;;  %s36_s12 = int_to_ptr.vmem [resolvable:$true] %s35_s12 }
  0x15   :  { %p939_p9 = scmp.lt.u32.totalorder %s935_s15, %s1211_s3 }
  0x17   :  { %p941_p10 = pnand %p939_p9, %p936_p8 }
  0x19   :  { %944 = shalt.err (!%p941_p10)
}
  0x1a   :  { %s945_s20 = scalar_lea.vmem %s36_s12, 512  ;;  %p950_p12 = scmp.lt.s32.totalorder %s36_s12, %s36_s12 }
  0x1b   :  { %p946_p11 = scmp.ne.s32.totalorder %s36_s12, %s945_s20  ;;  %p951_p13 = scmp.lt.s32.totalorder %s945_s20, %s945_s20 }
  0x1d   :  { %p952_p0 = por %p951_p13, %p950_p12 }
  0x1f   :  { %p953_p1 = pnand %p952_p0, %p946_p11 }
  0x21   :  { %956 = shalt.err (!%p953_p1)
}
  0x22   :  { %41 = dma.hbm_to_vmem [thread:$0]  %s1211_s3, 512, %s36_s12, [#allocation6], %s986_s7, %s986_s7, %s987_s8  }
  0x23   :  { %979 = dma.done.wait [#allocation3], 512  }
  0x24   :  { %980 = vsyncadd [#allocation3], 4294966784 }
  0x25   :  { %981 = dma.done.wait [#allocation6], 512  }
  0x26   :  { %982 = vsyncadd [#allocation6], 4294966784  ;;  %v52_v0 = vld [vmem:[%s1208_s0] sm:$0xff]  ;;  %v53_v1 = vld [vmem:[%s1208_s0 + $0x8] sm:$0xff]  ;;  %s990_s7 = smov 127   ;;  %vm135_vm0 = vcmask 785408   ;;  %v76_v21 = vlaneseq }
  0x27   :  { %v1070_v2 = vld [vmem:[%s1209_s1] ss:$0 sm:$0xff]  ;;  %v54_v5 = vld [vmem:[%s1208_s0 + $0x10] sm:$0xff]  ;;  %v55_v6 = vld [vmem:[%s1208_s0 + $0x18] sm:$0xff]  ;;  %s989_s1 = smov 1   ;;  %v991_v16 = vmov 0  }
  0x28   :  { %v83_v3 = vmul.f32 %v1070_v2, %v52_v0  ;;  %v84_v4 = vmul.f32 %v1070_v2, %v53_v1  ;;  %v85_v7 = vmul.f32 %v1070_v2, %v54_v5  ;;  %v86_v8 = vmul.f32 %v1070_v2, %v55_v6  ;;  %v57_v13 = vld [vmem:[#allocation2] sm:$0xff]  ;;  %v1090_v14 = vld [vmem:[%s1212_s4 + $0x8] sm:$0xff]  ;;  %877 = vset.pattern.permute.xlu1 %v991_v16  ;;  %v1102_v17 = vld [vmem:[%s1212_s4 + $0x10] sm:$0xff]  ;;  %s1001_s16 = smov [#allocation7]  }
  0x29   :  { %722 = vmatprep.mubr.msk.f32.mxu0 %vm135_vm0, %v57_v13  ;;  %v1095_v15 = vld [vmem:[%s1212_s4] sm:$0xff]  ;;  %876 = vset.pattern.permute.xlu0 %v991_v16  ;;  %v1107_v18 = vld [vmem:[%s1212_s4 + $0x18] sm:$0xff]  ;;  %v992_v19 = vmov 1   ;;  %v993_v20 = vmov 2   ;;  %v77_v22 = vand.u32 127, %v76_v21  ;;  %v58_v43 = vld [vmem:[#allocation2 + $0x8] sm:$0xff] }
  0x2a   :  { %v856_v9 = vpack.i.bf16 %v84_v4, %v83_v3  ;;  %v781_v10 = vpack.c.bf16 %v84_v4, %v83_v3  ;;  %v861_v11 = vpack.i.bf16 %v86_v8, %v85_v7  ;;  %v785_v12 = vpack.c.bf16 %v86_v8, %v85_v7  ;;  %v59_v44 = vld [vmem:[#allocation2 + $0x10] sm:$0xff]  ;;  %v60_v45 = vld [vmem:[#allocation2 + $0x18] sm:$0xff]  ;;  %v62_v28 = vld [vmem:[#allocation5 + $0x8] sm:$0xff]  ;;  %s624_s17 = sshll.u32 %s1001_s16, 4  ;;  %s625_s17 = int_to_ptr.vmem [resolvable:$true] %s624_s17 }
  0x2b   :  { %v635_v23 = vadd.s32 4294967280, %v77_v22  ;;  %vm78_vm1 = vcmp.ge.s32.totalorder %v77_v22, 16  ;;  %vm998_vm6 = vmmov 0   ;;  %vm543_vm7 = vcmask 261120   ;;  %s957_s18 = scalar_lea.vmem %s625_s17, 16  ;;  %s961_s19 = scalar_lea.vmem %s625_s17, 32 }
  0x2c   :  { %857 = vrot.lane.b32.xlu0 %v856_v9, %s989_s1  ;;  %867 = vrot.lane.b32.xlu1 %v856_v9, %s990_s7  ;;  %p958_p2 = scmp.ne.s32.totalorder %s625_s17, %s957_s18  ;;  %p962_p3 = scmp.lt.s32.totalorder %s625_s17, %s625_s17 }
  0x2d   :  { %v80_v24 = vsel %vm78_vm1, %v635_v23, %v77_v22  ;;  %p963_p4 = scmp.lt.s32.totalorder %s961_s19, %s957_s18 }
  0x2e   :  { %vm81_vm2 = vcmp.ge.s32.totalorder %v80_v24, 1  ;;  %vm82_vm4 = vcmp.le.s32.totalorder %v80_v24, 14 }
  0x2f   :  { %vm1119_vm3 = vmpackc.low %vm81_vm2, %vm81_vm2  ;;  %p964_p5 = por %p963_p4, %p962_p3 }
  0x30   :  { %862 = vrot.lane.b32.xlu0 %v861_v11, %s989_s1  ;;  %872 = vrot.lane.b32.xlu1 %v861_v11, %s990_s7  ;;  %vm1131_vm5 = vmpackc.low %vm82_vm4, %vm82_vm4 }
  0x31   :  { %p965_p6 = pnand %p964_p5, %p958_p2 }
  0x34   :  { %122 = vperm.xlu1 %877, %v1090_v14   ;;  %117 = vperm.xlu0 %876, %v1095_v15  }
  0x38   :  { %127 = vperm.xlu1 %877, %v1102_v17   ;;  %132 = vperm.xlu0 %876, %v1107_v18  }
  0x3c   :  { %878 = vset.pattern.permute.xlu1 %v992_v19  ;;  %879 = vset.pattern.permute.xlu0 %v992_v19 }
  0x3d   :  { %269 = vperm.xlu1 %878, %v1095_v15   ;;  %273 = vperm.xlu0 %879, %v1090_v14  }
  0x41   :  { %277 = vperm.xlu1 %878, %v1102_v17   ;;  %880 = vset.pattern.permute.xlu0 %v993_v20 }
  0x42   :  { %295 = vperm.xlu0 %880, %v1095_v15  }
  0x45   :  { %281 = vperm.xlu1 %878, %v1107_v18  }
  0x46   :  { %307 = vperm.xlu0 %880, %v1107_v18  }
  0x49   :  { %881 = vset.pattern.permute.xlu1 %v993_v20 }
  0x4a   :  { %299 = vperm.xlu1 %881, %v1090_v14  }
  0x4e   :  { %303 = vperm.xlu1 %881, %v1102_v17  }
  0x9e   :  { %v858_v25 = vpop.permute.xlu0 %857  ;;  %v868_v33 = vpop.permute.xlu1 %867 }
  0x9f   :  { %v860_v26 = vunpack.i.h.bf16 %v858_v25  ;;  %v859_v27 = vunpack.i.l.bf16 %v858_v25  ;;  %v870_v35 = vunpack.i.h.bf16 %v868_v33  ;;  %v869_v36 = vunpack.i.l.bf16 %v868_v33 }
  0xa1   :  { %v769_v29 = vpack.c.bf16 %v860_v26, %v859_v27  ;;  %v789_v38 = vpack.c.bf16 %v870_v35, %v869_v36 }
  0xa2   :  { %v863_v30 = vpop.permute.xlu0 %862  ;;  %v873_v37 = vpop.permute.xlu1 %872 }
  0xa3   :  { %v865_v31 = vunpack.i.h.bf16 %v863_v30  ;;  %v864_v32 = vunpack.i.l.bf16 %v863_v30  ;;  %771 = vmatprep.subr.msk.bf16.mxu0 %vm1119_vm3, %v769_v29  ;;  %v875_v39 = vunpack.i.h.bf16 %v873_v37  ;;  %v874_v40 = vunpack.i.l.bf16 %v873_v37 }
  0xa4   :  { %774 = vmatpush3.bf16.msk.msra.mxu0 %vm1119_vm3, %v769_v29 }
  0xa5   :  { %v775_v34 = vpack.c.bf16 %v865_v31, %v864_v32  ;;  %v795_v42 = vpack.c.bf16 %v875_v39, %v874_v40 }
  0xa7   :  { %777 = vmatprep.subr.msk.bf16.mxu0 %vm1119_vm3, %v775_v34 }
  0xa8   :  { %780 = vmatpush3.bf16.msk.msra.mxu0 %vm1119_vm3, %v775_v34 }
  0xa9   :  { %782 = vmatprep.subr.bf16.mxu0 %v781_v10 }
  0xac   :  { %784 = vmatpush3.bf16.msra.mxu0 %v781_v10 }
  0xad   :  { %786 = vmatprep.subr.bf16.mxu0 %v785_v12 }
  0xb0   :  { %788 = vmatpush3.bf16.msra.mxu0 %v785_v12 }
  0xb1   :  { %791 = vmatprep.subr.msk.bf16.mxu0 %vm1131_vm5, %v789_v38 }
  0xb3   :  { %v118_v46 = vpop.permute.xlu0 %117  ;;  %v123_v47 = vpop.permute.xlu1 %122 }
  0xb4   :  { %794 = vmatpush3.bf16.msk.msra.mxu0 %vm1131_vm5, %v789_v38 }
  0xb5   :  { %797 = vmatprep.subr.msk.bf16.mxu0 %vm1131_vm5, %v795_v42 }
  0xb7   :  { %v133_v52 = vpop.permute.xlu0 %132  ;;  %v128_v57 = vpop.permute.xlu1 %127 }
  0xb8   :  { %800 = vmatpush3.bf16.msk.msra.mxu0 %vm1131_vm5, %v795_v42 }
  0xbb   :  { %723 = vmatmul.mubr.msk.f32.vlgmr.msra.gmra.mrb[0].mxu0 %vm135_vm0, %v58_v43 }
  0xbc   :  { %725 = vmatprep.mubr.msk.f32.mxu0 %vm135_vm0, %v59_v44  ;;  %v270_v22 = vpop.permute.xlu1 %269  ;;  %v274_v38 = vpop.permute.xlu0 %273 }
  0xbf   :  { %726 = vmatmul.mubr.msk.f32.gmra.mrb[2].mxu0 %vm135_vm0, %v60_v45 }
  0xc0   :  { %v278_v31 = vpop.permute.xlu1 %277 }
  0xc1   :  { %v296_v40 = vpop.permute.xlu0 %295 }
  0xc4   :  { %v282_v37 = vpop.permute.xlu1 %281 }
  0xc9   :  { %v300_v39 = vpop.permute.xlu1 %299 }
 0x18e   :  { %v724_v48 = vpop.f32.mrb[0].mxu0 }
 0x18f   :  { %v220_v49 = vadd.f32 %v724_v48, %v123_v47  ;;  %v214_v50 = vpop.f32.mrb[1].mxu0  ;;  %v304_v47 = vpop.permute.xlu1 %303 }
 0x190   :  { %v215_v51 = vadd.f32 %v214_v50, %v118_v46  ;;  %v308_v48 = vpop.permute.xlu0 %307 }
 0x191   :  { %v234_v53 = vmax.f32 %v220_v49, 0.0 }
 0x192   :  { %v233_v54 = vmax.f32 %v215_v51, 0.0  ;;  %v727_v55 = vpop.f32.mrb[2].mxu0 }
 0x193   :  { %v249_v56 = vmul.f32 %v234_v53, %v234_v53  ;;  %v230_v58 = vadd.f32 %v727_v55, %v133_v52  ;;  %v224_v59 = vpop.f32.mrb[3].mxu0 }
 0x194   :  { %v237_v60 = vadd.f32 %v234_v53, %v233_v54  ;;  %v248_v61 = vmul.f32 %v233_v54, %v233_v54  ;;  %v225_v62 = vadd.f32 %v224_v59, %v128_v57 }
 0x195   :  { %v236_v0 = vmax.f32 %v230_v58, 0.0 }
 0x196   :  { %v252_v63 = vadd.f32 %v249_v56, %v248_v61  ;;  %v235_v1 = vmax.f32 %v225_v62, 0.0 }
 0x197   :  { %v251_v5 = vmul.f32 %v236_v0, %v236_v0 }
 0x198   :  { %v238_v3 = vadd.f32 %v237_v60, %v235_v1  ;;  %v250_v4 = vmul.f32 %v235_v1, %v235_v1 }
 0x19a   :  { %v239_v6 = vadd.f32 %v238_v3, %v236_v0  ;;  %v253_v7 = vadd.f32 %v252_v63, %v250_v4  ;;  %v994_v3 = vmov 3   ;;  %v995_v4 = vmov 4  }
 0x19b   :  { %902 = vset.pattern.permute.xlu1 %v994_v3  ;;  %903 = vset.pattern.permute.xlu0 %v994_v3 }
 0x19c   :  { %v240_v8 = vrot.slane %v239_v6, 4  ;;  %v254_v9 = vadd.f32 %v253_v7, %v251_v5  ;;  %v996_v5 = vmov 5  }
 0x19e   :  { %v241_v10 = vadd.f32 %v240_v8, %v239_v6  ;;  %v255_v11 = vrot.slane %v254_v9, 4 }
 0x1a0   :  { %v242_v12 = vrot.slane %v241_v10, 2  ;;  %v256_v13 = vadd.f32 %v255_v11, %v254_v9 }
 0x1a2   :  { %v243_v16 = vadd.f32 %v242_v12, %v241_v10  ;;  %v257_v19 = vrot.slane %v256_v13, 2 }
 0x1a4   :  { %v244_v20 = vrot.slane %v243_v16, 1  ;;  %v258_v21 = vadd.f32 %v257_v19, %v256_v13 }
 0x1a6   :  { %v245_v23 = vadd.f32 %v244_v20, %v243_v16  ;;  %v259_v24 = vrot.slane %v258_v21, 1 }
 0x1a8   :  { %v247_v25 = vmul.f32 0.03125, %v245_v23  ;;  %v260_v26 = vadd.f32 %v259_v24, %v258_v21  ;;  %v63_v23 = vld [vmem:[#allocation5 + $0x10] sm:$0xff]  ;;  %v64_v24 = vld [vmem:[#allocation5 + $0x18] sm:$0xff] }
 0x1aa   :  { %v261_v27 = vmul.f32 0.03125, %v260_v26  ;;  %v262_v29 = vmul.f32 %v247_v25, %v247_v25  ;;  %v264_v30 = vsub.f32 %v233_v54, %v247_v25  ;;  %v266_v32 = vsub.f32 %v235_v1, %v247_v25  ;;  %v61_v1 = vld [vmem:[#allocation5] sm:$0xff] }
 0x1ab   :  { %v267_v33 = vsub.f32 %v236_v0, %v247_v25  ;;  %v265_v34 = vsub.f32 %v234_v53, %v247_v25  ;;  %752 = vmatprep.mubr.msk.f32.mxu1 %vm135_vm0, %v61_v1  ;;  %v997_v25 = vmov 0.0|0.0   ;;  %v999_v26 = vmov 0.0  }
 0x1ac   :  { %v263_v35 = vsub.f32 %v261_v27, %v262_v29  ;;  %v284_v42 = vmul.f32 %v270_v22, %v264_v30  ;;  %v286_v43 = vmul.f32 %v278_v31, %v266_v32  ;;  %833 = vmatprep.subr.bf16.mxu0 %v997_v25  ;;  %766 = vmatprep.mubr.msk.f32.mxu0 %vm998_vm6, %v999_v26  ;;  %v1000_v27 = vmov 6  }
 0x1ad   :  { %v287_v44 = vmul.f32 %v282_v37, %v267_v33  ;;  %v285_v45 = vmul.f32 %v274_v38, %v265_v34 }
 0x1ae   :  { %v288_v36 = vadd.f32 0.0001, %v263_v35 }
 0x1b0   :  { %909 = vrsqrt.f32 %v288_v36 }
 0x1ba   :  { %v910_v46 = vpop.eup %909 }
 0x1bb   :  { %v291_v49 = vmul.f32 %v910_v46, %v285_v45  ;;  %v290_v50 = vmul.f32 %v910_v46, %v284_v42  ;;  %v292_v51 = vmul.f32 %v910_v46, %v286_v43  ;;  %v293_v52 = vmul.f32 %v910_v46, %v287_v44 }
 0x1bd   :  { %v311_v54 = vadd.f32 %v300_v39, %v291_v49  ;;  %v310_v53 = vadd.f32 %v296_v40, %v290_v50  ;;  %v312_v55 = vadd.f32 %v304_v47, %v292_v51  ;;  %v313_v56 = vadd.f32 %v308_v48, %v293_v52 }
 0x1bf   :  { %v315_v57 = vmul.f32 %v1070_v2, %v311_v54  ;;  %v314_v58 = vmul.f32 %v1070_v2, %v310_v53  ;;  %v316_v59 = vmul.f32 %v1070_v2, %v312_v55  ;;  %v317_v60 = vmul.f32 %v1070_v2, %v313_v56 }
 0x1c1   :  { %v887_v61 = vpack.i.bf16 %v317_v60, %v316_v59  ;;  %v882_v62 = vpack.i.bf16 %v315_v57, %v314_v58  ;;  %v813_v63 = vpack.c.bf16 %v315_v57, %v314_v58  ;;  %v817_v0 = vpack.c.bf16 %v317_v60, %v316_v59 }
 0x1c3   :  { %888 = vrot.lane.b32.xlu0 %v887_v61, %s989_s1  ;;  %883 = vrot.lane.b32.xlu1 %v882_v62, %s989_s1 }
 0x1c7   :  { %898 = vrot.lane.b32.xlu0 %v887_v61, %s990_s7  ;;  %893 = vrot.lane.b32.xlu1 %v882_v62, %s990_s7 }
 0x1cb   :  { %343 = vperm.xlu1 %902, %v1095_v15   ;;  %347 = vperm.xlu0 %903, %v1090_v14  }
 0x1cf   :  { %351 = vperm.xlu1 %902, %v1102_v17   ;;  %904 = vset.pattern.permute.xlu0 %v995_v4 }
 0x1d0   :  { %490 = vperm.xlu0 %904, %v1095_v15  }
 0x1d3   :  { %355 = vperm.xlu1 %902, %v1107_v18  }
 0x1d4   :  { %502 = vperm.xlu0 %904, %v1107_v18  }
 0x1d7   :  { %905 = vset.pattern.permute.xlu1 %v995_v4 }
 0x1d8   :  { %494 = vperm.xlu1 %905, %v1090_v14   ;;  %907 = vset.pattern.permute.xlu0 %v996_v5 }
 0x1d9   :  { %520 = vperm.xlu0 %907, %v1090_v14  }
 0x1dc   :  { %498 = vperm.xlu1 %905, %v1102_v17  }
 0x1dd   :  { %908 = vset.pattern.permute.xlu0 %v1000_v27 }
 0x1de   :  { %540 = vperm.xlu0 %908, %v1095_v15  }
 0x1e0   :  { %906 = vset.pattern.permute.xlu1 %v996_v5 }
 0x1e1   :  { %516 = vperm.xlu1 %906, %v1095_v15  }
 0x1e5   :  { %524 = vperm.xlu1 %906, %v1102_v17  }
 0x1e9   :  { %528 = vperm.xlu1 %906, %v1107_v18  }
 0x235   :  { %v889_v6 = vpop.permute.xlu0 %888  ;;  %v884_v7 = vpop.permute.xlu1 %883 }
 0x236   :  { %v891_v8 = vunpack.i.h.bf16 %v889_v6  ;;  %v890_v9 = vunpack.i.l.bf16 %v889_v6  ;;  %v886_v10 = vunpack.i.h.bf16 %v884_v7  ;;  %v885_v11 = vunpack.i.l.bf16 %v884_v7 }
 0x238   :  { %v801_v12 = vpack.c.bf16 %v886_v10, %v885_v11  ;;  %v807_v13 = vpack.c.bf16 %v891_v8, %v890_v9 }
 0x239   :  { %v894_v14 = vpop.permute.xlu1 %893  ;;  %v899_v16 = vpop.permute.xlu0 %898 }
 0x23a   :  { %803 = vmatprep.subr.msk.bf16.mxu1 %vm1119_vm3, %v801_v12  ;;  %v896_v17 = vunpack.i.h.bf16 %v894_v14  ;;  %v895_v18 = vunpack.i.l.bf16 %v894_v14  ;;  %v901_v19 = vunpack.i.h.bf16 %v899_v16  ;;  %v900_v20 = vunpack.i.l.bf16 %v899_v16 }
 0x23b   :  { %806 = vmatpush3.bf16.msk.msra.mxu1 %vm1119_vm3, %v801_v12 }
 0x23c   :  { %809 = vmatprep.subr.msk.bf16.mxu1 %vm1119_vm3, %v807_v13  ;;  %v821_v21 = vpack.c.bf16 %v896_v17, %v895_v18  ;;  %v827_v22 = vpack.c.bf16 %v901_v19, %v900_v20 }
 0x23f   :  { %812 = vmatpush3.bf16.msk.msra.mxu1 %vm1119_vm3, %v807_v13 }
 0x240   :  { %814 = vmatprep.subr.bf16.mxu1 %v813_v63 }
 0x243   :  { %816 = vmatpush3.bf16.msra.mxu1 %v813_v63 }
 0x244   :  { %818 = vmatprep.subr.bf16.mxu1 %v817_v0 }
 0x247   :  { %820 = vmatpush3.bf16.msra.mxu1 %v817_v0 }
 0x248   :  { %823 = vmatprep.subr.msk.bf16.mxu1 %vm1131_vm5, %v821_v21 }
 0x24a   :  { %v344_v41 = vpop.permute.xlu1 %343  ;;  %v348_v30 = vpop.permute.xlu0 %347 }
 0x24b   :  { %826 = vmatpush3.bf16.msk.msra.mxu1 %vm1131_vm5, %v821_v21 }
 0x24c   :  { %829 = vmatprep.subr.msk.bf16.mxu1 %vm1131_vm5, %v827_v22 }
 0x24e   :  { %v352_v29 = vpop.permute.xlu1 %351 }
 0x24f   :  { %832 = vmatpush3.bf16.msk.msra.mxu1 %vm1131_vm5, %v827_v22  ;;  %v491_v14 = vpop.permute.xlu0 %490 }
 0x252   :  { %753 = vmatmul.mubr.msk.f32.vlgmr.msra.gmra.mrb[0].mxu1 %vm135_vm0, %v62_v28  ;;  %v356_v36 = vpop.permute.xlu1 %355 }
 0x253   :  { %755 = vmatprep.mubr.msk.f32.mxu1 %vm135_vm0, %v63_v23  ;;  %v503_v18 = vpop.permute.xlu0 %502 }
 0x256   :  { %756 = vmatmul.mubr.msk.f32.gmra.mrb[2].mxu1 %vm135_vm0, %v64_v24 }
 0x257   :  { %v495_v63 = vpop.permute.xlu1 %494 }
 0x258   :  { %v521_v23 = vpop.permute.xlu0 %520 }
 0x25b   :  { %v499_v9 = vpop.permute.xlu1 %498 }
 0x260   :  { %v517_v17 = vpop.permute.xlu1 %516 }
 0x264   :  { %v525_v16 = vpop.permute.xlu1 %524 }
 0x325   :  { %v754_v31 = vpop.f32.mrb[0].mxu1 }
 0x326   :  { %v442_v32 = vadd.f32 %v754_v31, %v348_v30  ;;  %v436_v33 = vpop.f32.mrb[1].mxu1 }
 0x327   :  { %v437_v34 = vadd.f32 %v436_v33, %v344_v41 }
 0x328   :  { %v456_v35 = vmax.f32 %v442_v32, 0.0 }
 0x329   :  { %v455_v37 = vmax.f32 %v437_v34, 0.0  ;;  %v757_v38 = vpop.f32.mrb[2].mxu1 }
 0x32a   :  { %v470_v39 = vmul.f32 %v456_v35, %v456_v35  ;;  %v452_v40 = vadd.f32 %v757_v38, %v356_v36  ;;  %v446_v42 = vpop.f32.mrb[3].mxu1 }
 0x32b   :  { %v459_v43 = vadd.f32 %v456_v35, %v455_v37  ;;  %v469_v44 = vmul.f32 %v455_v37, %v455_v37  ;;  %v447_v45 = vadd.f32 %v446_v42, %v352_v29  ;;  %v529_v29 = vpop.permute.xlu1 %528  ;;  %v541_v42 = vpop.permute.xlu0 %540 }
 0x32c   :  { %v458_v47 = vmax.f32 %v452_v40, 0.0  ;;  %v69_v40 = vld [vmem:[%s1213_s5] sm:$0x1] }
 0x32d   :  { %v473_v46 = vadd.f32 %v470_v39, %v469_v44  ;;  %v457_v15 = vmax.f32 %v447_v45, 0.0 }
 0x32e   :  { %v472_v50 = vmul.f32 %v458_v47, %v458_v47 }
 0x32f   :  { %v460_v48 = vadd.f32 %v459_v43, %v457_v15  ;;  %v471_v49 = vmul.f32 %v457_v15, %v457_v15 }
 0x331   :  { %v461_v51 = vadd.f32 %v460_v48, %v458_v47  ;;  %v474_v52 = vadd.f32 %v473_v46, %v471_v49 }
 0x333   :  { %v462_v54 = vrot.slane %v461_v51, 4  ;;  %v475_v53 = vadd.f32 %v474_v52, %v472_v50 }
 0x335   :  { %v463_v55 = vadd.f32 %v462_v54, %v461_v51  ;;  %v476_v56 = vrot.slane %v475_v53, 4 }
 0x337   :  { %v464_v57 = vrot.slane %v463_v55, 2  ;;  %v477_v58 = vadd.f32 %v476_v56, %v475_v53 }
 0x339   :  { %v465_v59 = vadd.f32 %v464_v57, %v463_v55  ;;  %v478_v60 = vrot.slane %v477_v58, 2 }
 0x33b   :  { %v466_v61 = vrot.slane %v465_v59, 1  ;;  %v479_v62 = vadd.f32 %v478_v60, %v477_v58 }
 0x33d   :  { %v467_v0 = vadd.f32 %v466_v61, %v465_v59  ;;  %v480_v1 = vrot.slane %v479_v62, 1 }
 0x33f   :  { %v468_v3 = vmul.f32 0.03125, %v467_v0  ;;  %v481_v4 = vadd.f32 %v480_v1, %v479_v62 }
 0x341   :  { %v482_v5 = vmul.f32 0.03125, %v481_v4  ;;  %v483_v6 = vmul.f32 %v468_v3, %v468_v3  ;;  %v485_v7 = vsub.f32 %v455_v37, %v468_v3  ;;  %v486_v8 = vsub.f32 %v456_v35, %v468_v3 }
 0x342   :  { %v488_v10 = vsub.f32 %v458_v47, %v468_v3  ;;  %v487_v11 = vsub.f32 %v457_v15, %v468_v3 }
 0x343   :  { %v484_v12 = vsub.f32 %v482_v5, %v483_v6  ;;  %v505_v19 = vmul.f32 %v491_v14, %v485_v7  ;;  %v506_v20 = vmul.f32 %v495_v63, %v486_v8 }
 0x344   :  { %v508_v21 = vmul.f32 %v503_v18, %v488_v10  ;;  %v507_v22 = vmul.f32 %v499_v9, %v487_v11 }
 0x345   :  { %v509_v13 = vadd.f32 0.0001, %v484_v12 }
 0x347   :  { %911 = vrsqrt.f32 %v509_v13 }
 0x351   :  { %v912_v28 = vpop.eup %911 }
 0x352   :  { %v511_v24 = vmul.f32 %v912_v28, %v505_v19  ;;  %v513_v26 = vmul.f32 %v912_v28, %v507_v22  ;;  %v514_v27 = vmul.f32 %v912_v28, %v508_v21  ;;  %v512_v41 = vmul.f32 %v912_v28, %v506_v20 }
 0x354   :  { %v531_v30 = vadd.f32 %v517_v17, %v511_v24  ;;  %v533_v31 = vadd.f32 %v525_v16, %v513_v26  ;;  %v534_v32 = vadd.f32 %v529_v29, %v514_v27  ;;  %v532_v33 = vadd.f32 %v521_v23, %v512_v41 }
 0x356   :  { %v535_v34 = vmul.f32 %v1070_v2, %v531_v30  ;;  %v537_v35 = vmul.f32 %v1070_v2, %v533_v31  ;;  %v538_v36 = vmul.f32 %v1070_v2, %v534_v32  ;;  %v536_v37 = vmul.f32 %v1070_v2, %v532_v33 }
 0x358   :  { %v837_v38 = vpack.c.bf16 %v538_v36, %v537_v35  ;;  %v834_v39 = vpack.c.bf16 %v536_v37, %v535_v34 }
 0x35a   :  { %835 = vmatpush3.bf16.msra.mxu0 %v834_v39 }
 0x35b   :  { %836 = vmatprep.subr.bf16.mxu0 %v997_v25 }
 0x35e   :  { %838 = vmatpush3.bf16.msra.mxu0 %v837_v38 }
 0x361   :  { %767 = vmatmul.mubr.msk.f32.vlgmr.msra.gmra.mrb[4].mxu0 %vm543_vm7, %v69_v40 }
 0x434   :  { %v613_v43 = vpop.f32.mrb[4].mxu0 }
 0x435   :  { %v614_v44 = vadd.f32 %v613_v43, %v541_v42  ;;  %v768_v45 = vpop.f32.mrb[5].mxu0 }
 0x437   :  { %617 = vst [vmem:[#allocation7] sm:$0x1] %v614_v44 }
 0x438   :  { %968 = shalt.err (!%p965_p6)
}
 0x439   :  { %s969_s2 = scalar_lea.hbm %s1214_s6, 16 }
 0x43a   :  { %p970_p7 = scmp.ne.s32.totalorder %s1214_s6, %s969_s2  ;;  %p973_p8 = scmp.lt.u32.totalorder %s969_s2, %s1214_s6 }
 0x43c   :  { %p975_p9 = pnand %p973_p8, %p970_p7 }
 0x43e   :  { %978 = shalt.err (!%p975_p9)
}
 0x43f   :  { %627 = dma.vmem_to_hbm [thread:$0]  %s625_s17, 16, %s1214_s6, [#allocation4]  }
 0x440   :  { %983 = dma.done.wait [#allocation4], 16  }
 0x441   :  { %984 = vsyncadd [#allocation4], 4294967280 }
 0x442   :  { %631 = vsyncpa [#allocation3], 1 }
 0x443   :  { %632 = vsyncpa [#allocation6], 1 }
 0x444   :  { %633 = vsyncpa [#allocation4], 1 }

</bundles_post_ra>
